<compile_context>
chip_gen: v6e
topology: v6e:2x2x1
jax: 0.10.0
libtpu: 0.0.40
codegen_flags: <defaults>
</compile_context>

<pallas_src>
import jax
import jax.numpy as jnp
from jax import lax
from jax.experimental import pallas as pl
from jax.experimental.pallas import tpu as pltpu

# ----------------------------- problem sizes -----------------------------
B = 2          # batch
L = 16         # sequence length
FEAT = 32      # feature_size
HID = 32       # hidden_size
NDESC = 8      # num_desc
EPS = 1e-5     # BatchNorm1d default eps

NF = NDESC * FEAT                       # 256: lane-dense output row width (multiple of 128)

# dot_general dimension numbers (2-D, no batch dims)
_TN = (((0,), (0,)), ((), ()))          # contract dim 0 of both: A_b^T @ X_b, no transpose op
_NT = (((1,), (1,)), ((), ()))          # contract dim 1 of both: A_b @ A_b^T (flash-attn form)


# ------------------------------ fused kernel ------------------------------
def self_attn_kernel(x_ref, w_ref, gb_ref, out_ref):
    x = x_ref[...]                                   # (B, L, F) f32
    w1 = w_ref[0]                                    # (F, H)  bf16  (= W1^T)
    w2p = w_ref[1]                                   # (H, H)  bf16  (= W2^T, zero-padded lanes)

    # --- projections: single-pass bf16 MXU matmuls, f32 accumulation ---
    x2 = x.reshape(B * L, FEAT).astype(jnp.bfloat16)
    s1 = jnp.tanh(jnp.dot(x2, w1, preferred_element_type=jnp.float32))           # (B*L, H) f32
    logits = jnp.dot(s1.astype(jnp.bfloat16), w2p,
                     preferred_element_type=jnp.float32)[:, :NDESC]              # (B*L, D) f32
    logits = logits.reshape(B, L, NDESC)

    # --- softmax over the sequence axis (dim=1) ---
    mx = jnp.max(logits, axis=1, keepdims=True)
    e = jnp.exp(logits - mx)
    a = e / jnp.sum(e, axis=1, keepdims=True)                                     # (B, L, D) f32

    # --- per-batch contractions over L, kept in vregs (no VMEM scratch, no .T) ---
    xa_rows = []
    gram_sq = jnp.float32(0.0)
    for b in range(B):                               # B = 2: static unroll
        ab = a[b]                                    # (L, D)
        xa_rows.append(lax.dot_general(ab, x[b], _TN,
                                       preferred_element_type=jnp.float32))      # (D, F) = A^T X
        g = lax.dot_general(ab, ab, _NT, preferred_element_type=jnp.float32)     # (L, L) = A A^T
        gram_sq = gram_sq + jnp.sum(g * g)           # ||A_b A_b^T||_F^2 == ||A_b^T A_b||_F^2
    xa = jnp.concatenate(xa_rows, axis=0)            # (B*D, F), vreg-resident

    # penalty: sum_b ||A_b^T A_b - I||_F^2 / B  =  (sum_b ||A_b A_b^T||_F^2 - 2*sum(A^2) + B*D)/B
    pen = (gram_sq - 2.0 * jnp.sum(a * a) + jnp.float32(B * NDESC)) * (1.0 / B)

    # --- BatchNorm1d(FEAT), training-mode batch stats, single axis-0 reduce on (B*D, F) ---
    # TODO(synk): BatchNorm1d running_mean/running_var state updates are module side effects
    # and are not emitted; outputs match the training-mode forward exactly.
    mean = jnp.mean(xa, axis=0, keepdims=True)                                    # (1, F)
    var = jnp.mean((xa - mean) ** 2, axis=0, keepdims=True)                       # biased variance
    m2d = (xa - mean) * lax.rsqrt(var + EPS) * gb_ref[0:1, :] + gb_ref[1:2, :]    # (B*D, F)

    # --- lane-dense output slab: rows 0..B-1 = M(b) flattened onto 256 lanes, row B = penalty.
    # The cheap in-VMEM slice stores below feed a 256-lane output tile, so the HBM writeback
    # DMA is dense instead of moving mostly-padded 32-lane rows.
    m3 = m2d.reshape(B, NDESC, FEAT)                 # leading-dim split only (free)
    for d in range(NDESC):
        out_ref[0:B, d * FEAT:(d + 1) * FEAT] = m3[:, d, :]
    out_ref[B:B + 1, :] = jnp.broadcast_to(pen, (1, NF))


# ------------------------------- wrapper -------------------------------
def self_attn_forward(x, w1, w2, gamma, beta):
    """x: (B, L, F); w1: (H, F); w2: (D, H); gamma/beta: (F,). Returns (M, penal)."""
    # One packed bf16 weight buffer (W2^T zero-padded from NDESC to HID lanes; relies on FEAT==HID)
    w2t_pad = jnp.zeros((HID, HID), jnp.float32).at[:, :NDESC].set(w2.T)
    wbuf = jnp.stack([w1.T, w2t_pad], axis=0).astype(jnp.bfloat16)       # (2, 32, 32) bf16
    gb = jnp.stack([gamma, beta], axis=0)                                # (2, F) f32

    out = pl.pallas_call(
        self_attn_kernel,
        out_shape=jax.ShapeDtypeStruct((B + 1, NF), jnp.float32),        # lane-dense slab
        in_specs=[
            pl.BlockSpec(memory_space=pltpu.MemorySpace.VMEM),           # x
            pl.BlockSpec(memory_space=pltpu.MemorySpace.VMEM),           # packed weights
            pl.BlockSpec(memory_space=pltpu.MemorySpace.VMEM),           # gamma/beta
        ],
        out_specs=pl.BlockSpec(memory_space=pltpu.MemorySpace.VMEM),
    )(x, wbuf, gb)

    m = out[:B].reshape(B, NDESC, FEAT)       # free row-major metadata reshape outside the kernel
    penal = out[B, 0]
    return m, penal


# ----------------------------- pure-JAX references -----------------------------
def reference_forward(x, w1, w2, gamma, beta, *, bf16_proj):
    """bf16_proj=True mirrors the kernel's bf16-input projections; False is the fp32 ground truth."""
    if bf16_proj:
        prec = None
        s1 = jnp.tanh(jnp.einsum("blf,hf->blh", x.astype(jnp.bfloat16), w1.astype(jnp.bfloat16),
                                 preferred_element_type=jnp.float32))
        logits = jnp.einsum("blh,dh->bld", s1.astype(jnp.bfloat16), w2.astype(jnp.bfloat16),
                            preferred_element_type=jnp.float32)
    else:
        prec = lax.Precision.HIGHEST
        s1 = jnp.tanh(jnp.einsum("blf,hf->blh", x, w1, precision=prec))
        logits = jnp.einsum("blh,dh->bld", s1, w2, precision=prec)
    A = jax.nn.softmax(logits, axis=1)                      # softmax over L
    XA = jnp.einsum("blf,bld->bfd", x, A, precision=prec)   # (B, F, D) == bmm(x^T, A)
    mean = XA.mean(axis=(0, 2), keepdims=True)
    var = ((XA - mean) ** 2).mean(axis=(0, 2), keepdims=True)
    Mn = (XA - mean) / jnp.sqrt(var + EPS) * gamma.reshape(1, -1, 1) + beta.reshape(1, -1, 1)
    M = jnp.transpose(Mn, (0, 2, 1))                        # (B, D, F)
    AAT = jnp.einsum("bld,ble->bde", A, A, precision=prec)  # (B, D, D)
    diff = AAT - jnp.eye(NDESC, dtype=jnp.float32)
    P = jnp.sqrt(jnp.sum(diff * diff))                      # torch.norm(AAT - I, 2) (flattened)
    penal = P * P / x.shape[0]
    return M, penal


if __name__ == "__main__":
    key = jax.random.PRNGKey(0)
    kx, k1, k2 = jax.random.split(key, 3)

    x = jax.random.normal(kx, (B, L, FEAT), dtype=jnp.float32)
    w1 = jax.random.uniform(k1, (HID, FEAT), jnp.float32, -1.0, 1.0) / jnp.sqrt(FEAT)
    w2 = jax.random.uniform(k2, (NDESC, HID), jnp.float32, -1.0, 1.0) / jnp.sqrt(HID)
    gamma = jnp.ones((FEAT,), jnp.float32)   # BatchNorm1d default affine init
    beta = jnp.zeros((FEAT,), jnp.float32)

    fwd = jax.jit(self_attn_forward)
    M, penal = fwd(x, w1, w2, gamma, beta)
    jax.block_until_ready((M, penal))
    assert M.shape == (B, NDESC, FEAT)

    # (1) tight check vs a reference that mirrors the kernel's bf16-input MXU projections
    M_m, pen_m = reference_forward(x, w1, w2, gamma, beta, bf16_proj=True)
    assert jnp.allclose(M, M_m, rtol=2e-3, atol=2e-3), "M mismatch vs bf16-matched reference"
    assert jnp.allclose(penal, pen_m, rtol=1e-2, atol=1e-2), "penal mismatch vs bf16-matched reference"

    # (2) looser check vs the full-fp32 ground truth (single-pass bf16 MXU inputs cost ~3 digits)
    M_f, pen_f = reference_forward(x, w1, w2, gamma, beta, bf16_proj=False)
    assert jnp.allclose(M, M_f, rtol=5e-2, atol=5e-2), "M mismatch vs fp32 reference"
    assert jnp.allclose(penal, pen_f, rtol=5e-2, atol=5e-2), "penal mismatch vs fp32 reference"

    print("KERNEL_OK")
</pallas_src>

<mosaic_0001>
module attributes {stable_mosaic.version = 11 : i64} {
  func.func @self_attn_kernel(%arg0: memref<2x16x32xf32, #tpu.memory_space<vmem>>, %arg1: memref<2x32x32xbf16, #tpu.memory_space<vmem>>, %arg2: memref<2x32xf32, #tpu.memory_space<vmem>>, %arg3: memref<3x256xf32, #tpu.memory_space<vmem>>) attributes {dimension_semantics = [], scalar_prefetch = 0 : i64, scratch_operands = 0 : i64, tpu.core_type = #tpu.core_type<tc>} {
    %c0 = arith.constant 0 : index
    %c0_0 = arith.constant 0 : index
    %c0_1 = arith.constant 0 : index
    %0 = vector.load %arg0[%c0, %c0_0, %c0_1] : memref<2x16x32xf32, #tpu.memory_space<vmem>>, vector<2x16x32xf32>
    %c0_2 = arith.constant 0 : index
    %c0_3 = arith.constant 0 : index
    %c0_4 = arith.constant 0 : index
    %1 = vector.load %arg1[%c0_2, %c0_3, %c0_4] : memref<2x32x32xbf16, #tpu.memory_space<vmem>>, vector<1x32x32xbf16>
    %2 = vector.shape_cast %1 : vector<1x32x32xbf16> to vector<32x32xbf16>
    %c1 = arith.constant 1 : index
    %c0_5 = arith.constant 0 : index
    %c0_6 = arith.constant 0 : index
    %3 = vector.load %arg1[%c1, %c0_5, %c0_6] : memref<2x32x32xbf16, #tpu.memory_space<vmem>>, vector<1x32x32xbf16>
    %4 = vector.shape_cast %3 : vector<1x32x32xbf16> to vector<32x32xbf16>
    %5 = vector.shape_cast %0 : vector<2x16x32xf32> to vector<32x32xf32>
    %6 = arith.truncf %5 : vector<32x32xf32> to vector<32x32xbf16>
    %cst = arith.constant dense<0.000000e+00> : vector<32x32xf32>
    %7 = tpu.matmul %6, %2, %cst {dimension_numbers = #tpu.dot_dimension_numbers<[1], [0], [0], [1], [0, 0, 1, 1], [], []>} : vector<32x32xbf16>, vector<32x32xbf16>, vector<32x32xf32> -> vector<32x32xf32>
    %8 = math.tanh %7 : vector<32x32xf32>
    %9 = arith.truncf %8 : vector<32x32xf32> to vector<32x32xbf16>
    %cst_7 = arith.constant dense<0.000000e+00> : vector<32x32xf32>
    %10 = tpu.matmul %9, %4, %cst_7 {dimension_numbers = #tpu.dot_dimension_numbers<[1], [0], [0], [1], [0, 0, 1, 1], [], []>} : vector<32x32xbf16>, vector<32x32xbf16>, vector<32x32xf32> -> vector<32x32xf32>
    %11 = vector.extract_strided_slice %10 {offsets = [0, 0], sizes = [32, 8], strides = [1, 1]} : vector<32x32xf32> to vector<32x8xf32>
    %12 = vector.shape_cast %11 : vector<32x8xf32> to vector<2x16x8xf32>
    %cst_8 = arith.constant dense<0xFF800000> : vector<2x8xf32>
    %13 = vector.multi_reduction <maximumf>, %12, %cst_8 [1] : vector<2x16x8xf32> to vector<2x8xf32>
    %14 = vector.shape_cast %13 : vector<2x8xf32> to vector<2x1x8xf32>
    %15 = vector.broadcast %14 : vector<2x1x8xf32> to vector<2x16x8xf32>
    %16 = arith.subf %12, %15 : vector<2x16x8xf32>
    %17 = math.exp %16 : vector<2x16x8xf32>
    %cst_9 = arith.constant dense<0.000000e+00> : vector<2x8xf32>
    %18 = vector.multi_reduction <add>, %17, %cst_9 [1] : vector<2x16x8xf32> to vector<2x8xf32>
    %19 = vector.shape_cast %18 : vector<2x8xf32> to vector<2x1x8xf32>
    %20 = vector.broadcast %19 : vector<2x1x8xf32> to vector<2x16x8xf32>
    %21 = arith.divf %17, %20 : vector<2x16x8xf32>
    %22 = vector.extract_strided_slice %21 {offsets = [0, 0, 0], sizes = [1, 16, 8], strides = [1, 1, 1]} : vector<2x16x8xf32> to vector<1x16x8xf32>
    %23 = vector.shape_cast %22 : vector<1x16x8xf32> to vector<16x8xf32>
    %24 = vector.extract_strided_slice %0 {offsets = [0, 0, 0], sizes = [1, 16, 32], strides = [1, 1, 1]} : vector<2x16x32xf32> to vector<1x16x32xf32>
    %25 = vector.shape_cast %24 : vector<1x16x32xf32> to vector<16x32xf32>
    %cst_10 = arith.constant dense<0.000000e+00> : vector<8x32xf32>
    %26 = tpu.matmul %23, %25, %cst_10 {dimension_numbers = #tpu.dot_dimension_numbers<[0], [0], [1], [1], [0, 1, 1, 1], [], []>} : vector<16x8xf32>, vector<16x32xf32>, vector<8x32xf32> -> vector<8x32xf32>
    %cst_11 = arith.constant dense<0.000000e+00> : vector<16x16xf32>
    %27 = tpu.matmul %23, %23, %cst_11 {dimension_numbers = #tpu.dot_dimension_numbers<[1], [1], [0], [0], [0, 0, 1, 0], [], []>} : vector<16x8xf32>, vector<16x8xf32>, vector<16x16xf32> -> vector<16x16xf32>
    %28 = arith.mulf %27, %27 : vector<16x16xf32>
    %29 = vector.shape_cast %28 : vector<16x16xf32> to vector<1x16x16xf32>
    %cst_12 = arith.constant dense<0.000000e+00> : vector<1xf32>
    %30 = vector.multi_reduction <add>, %29, %cst_12 [1, 2] : vector<1x16x16xf32> to vector<1xf32>
    %31 = vector.shape_cast %30 : vector<1xf32> to vector<1x1x1xf32>
    %32 = vector.extract %31[0, 0, 0] : f32 from vector<1x1x1xf32>
    %cst_13 = arith.constant 0.000000e+00 : f32
    %33 = arith.addf %cst_13, %32 : f32
    %34 = vector.extract_strided_slice %21 {offsets = [1, 0, 0], sizes = [1, 16, 8], strides = [1, 1, 1]} : vector<2x16x8xf32> to vector<1x16x8xf32>
    %35 = vector.shape_cast %34 : vector<1x16x8xf32> to vector<16x8xf32>
    %36 = vector.extract_strided_slice %0 {offsets = [1, 0, 0], sizes = [1, 16, 32], strides = [1, 1, 1]} : vector<2x16x32xf32> to vector<1x16x32xf32>
    %37 = vector.shape_cast %36 : vector<1x16x32xf32> to vector<16x32xf32>
    %cst_14 = arith.constant dense<0.000000e+00> : vector<8x32xf32>
    %38 = tpu.matmul %35, %37, %cst_14 {dimension_numbers = #tpu.dot_dimension_numbers<[0], [0], [1], [1], [0, 1, 1, 1], [], []>} : vector<16x8xf32>, vector<16x32xf32>, vector<8x32xf32> -> vector<8x32xf32>
    %cst_15 = arith.constant dense<0.000000e+00> : vector<16x16xf32>
    %39 = tpu.matmul %35, %35, %cst_15 {dimension_numbers = #tpu.dot_dimension_numbers<[1], [1], [0], [0], [0, 0, 1, 0], [], []>} : vector<16x8xf32>, vector<16x8xf32>, vector<16x16xf32> -> vector<16x16xf32>
    %40 = arith.mulf %39, %39 : vector<16x16xf32>
    %41 = vector.shape_cast %40 : vector<16x16xf32> to vector<1x16x16xf32>
    %cst_16 = arith.constant dense<0.000000e+00> : vector<1xf32>
    %42 = vector.multi_reduction <add>, %41, %cst_16 [1, 2] : vector<1x16x16xf32> to vector<1xf32>
    %43 = vector.shape_cast %42 : vector<1xf32> to vector<1x1x1xf32>
    %44 = vector.extract %43[0, 0, 0] : f32 from vector<1x1x1xf32>
    %45 = arith.addf %33, %44 : f32
    %46 = tpu.concatenate %26, %38 in 0 : vector<8x32xf32>, vector<8x32xf32> -> vector<16x32xf32>
    %47 = arith.mulf %21, %21 : vector<2x16x8xf32>
    %48 = vector.shape_cast %47 : vector<2x16x8xf32> to vector<1x2x16x8xf32>
    %cst_17 = arith.constant dense<0.000000e+00> : vector<1xf32>
    %49 = vector.multi_reduction <add>, %48, %cst_17 [1, 2, 3] : vector<1x2x16x8xf32> to vector<1xf32>
    %50 = vector.shape_cast %49 : vector<1xf32> to vector<1x1x1x1xf32>
    %51 = vector.extract %50[0, 0, 0, 0] : f32 from vector<1x1x1x1xf32>
    %cst_18 = arith.constant 2.000000e+00 : f32
    %52 = arith.mulf %cst_18, %51 : f32
    %53 = arith.subf %45, %52 : f32
    %cst_19 = arith.constant 1.600000e+01 : f32
    %54 = arith.addf %53, %cst_19 : f32
    %cst_20 = arith.constant 5.000000e-01 : f32
    %55 = arith.mulf %54, %cst_20 : f32
    %cst_21 = arith.constant dense<0.000000e+00> : vector<32xf32>
    %56 = vector.multi_reduction <add>, %46, %cst_21 [0] : vector<16x32xf32> to vector<32xf32>
    %57 = vector.shape_cast %56 : vector<32xf32> to vector<1x32xf32>
    %cst_22 = arith.constant 1.600000e+01 : f32
    %58 = vector.broadcast %cst_22 : f32 to vector<1x32xf32>
    %59 = arith.divf %57, %58 : vector<1x32xf32>
    %60 = vector.broadcast %59 : vector<1x32xf32> to vector<16x32xf32>
    %61 = arith.subf %46, %60 : vector<16x32xf32>
    %62 = arith.mulf %61, %61 : vector<16x32xf32>
    %cst_23 = arith.constant dense<0.000000e+00> : vector<32xf32>
    %63 = vector.multi_reduction <add>, %62, %cst_23 [0] : vector<16x32xf32> to vector<32xf32>
    %64 = vector.shape_cast %63 : vector<32xf32> to vector<1x32xf32>
    %cst_24 = arith.constant 1.600000e+01 : f32
    %65 = vector.broadcast %cst_24 : f32 to vector<1x32xf32>
    %66 = arith.divf %64, %65 : vector<1x32xf32>
    %67 = vector.broadcast %59 : vector<1x32xf32> to vector<16x32xf32>
    %68 = arith.subf %46, %67 : vector<16x32xf32>
    %cst_25 = arith.constant 9.99999974E-6 : f32
    %69 = vector.broadcast %cst_25 : f32 to vector<1x32xf32>
    %70 = arith.addf %66, %69 : vector<1x32xf32>
    %71 = math.rsqrt %70 : vector<1x32xf32>
    %72 = vector.broadcast %71 : vector<1x32xf32> to vector<16x32xf32>
    %73 = arith.mulf %68, %72 : vector<16x32xf32>
    %c0_26 = arith.constant 0 : index
    %c0_27 = arith.constant 0 : index
    %74 = vector.load %arg2[%c0_26, %c0_27] : memref<2x32xf32, #tpu.memory_space<vmem>>, vector<1x32xf32>
    %75 = vector.broadcast %74 : vector<1x32xf32> to vector<16x32xf32>
    %76 = arith.mulf %73, %75 : vector<16x32xf32>
    %c1_28 = arith.constant 1 : index
    %c0_29 = arith.constant 0 : index
    %77 = vector.load %arg2[%c1_28, %c0_29] : memref<2x32xf32, #tpu.memory_space<vmem>>, vector<1x32xf32>
    %78 = vector.broadcast %77 : vector<1x32xf32> to vector<16x32xf32>
    %79 = arith.addf %76, %78 : vector<16x32xf32>
    %80 = vector.shape_cast %79 : vector<16x32xf32> to vector<2x8x32xf32>
    %81 = vector.extract_strided_slice %80 {offsets = [0, 0, 0], sizes = [2, 1, 32], strides = [1, 1, 1]} : vector<2x8x32xf32> to vector<2x1x32xf32>
    %82 = vector.shape_cast %81 : vector<2x1x32xf32> to vector<2x32xf32>
    %c0_30 = arith.constant 0 : index
    %c0_31 = arith.constant 0 : index
    %83 = vector.load %arg3[%c0_30, %c0_31] : memref<3x256xf32, #tpu.memory_space<vmem>>, vector<2x32xf32>
    tpu.vector_store %arg3[%c0_30, %c0_31], %82 {strides = array<i32>} : memref<3x256xf32, #tpu.memory_space<vmem>>, vector<2x32xf32>,
    %84 = vector.extract_strided_slice %80 {offsets = [0, 1, 0], sizes = [2, 1, 32], strides = [1, 1, 1]} : vector<2x8x32xf32> to vector<2x1x32xf32>
    %85 = vector.shape_cast %84 : vector<2x1x32xf32> to vector<2x32xf32>
    %c0_32 = arith.constant 0 : index
    %c32 = arith.constant 32 : index
    %86 = vector.load %arg3[%c0_32, %c32] : memref<3x256xf32, #tpu.memory_space<vmem>>, vector<2x32xf32>
    tpu.vector_store %arg3[%c0_32, %c32], %85 {strides = array<i32>} : memref<3x256xf32, #tpu.memory_space<vmem>>, vector<2x32xf32>,
    %87 = vector.extract_strided_slice %80 {offsets = [0, 2, 0], sizes = [2, 1, 32], strides = [1, 1, 1]} : vector<2x8x32xf32> to vector<2x1x32xf32>
    %88 = vector.shape_cast %87 : vector<2x1x32xf32> to vector<2x32xf32>
    %c0_33 = arith.constant 0 : index
    %c64 = arith.constant 64 : index
    %89 = vector.load %arg3[%c0_33, %c64] : memref<3x256xf32, #tpu.memory_space<vmem>>, vector<2x32xf32>
    tpu.vector_store %arg3[%c0_33, %c64], %88 {strides = array<i32>} : memref<3x256xf32, #tpu.memory_space<vmem>>, vector<2x32xf32>,
    %90 = vector.extract_strided_slice %80 {offsets = [0, 3, 0], sizes = [2, 1, 32], strides = [1, 1, 1]} : vector<2x8x32xf32> to vector<2x1x32xf32>
    %91 = vector.shape_cast %90 : vector<2x1x32xf32> to vector<2x32xf32>
    %c0_34 = arith.constant 0 : index
    %c96 = arith.constant 96 : index
    %92 = vector.load %arg3[%c0_34, %c96] : memref<3x256xf32, #tpu.memory_space<vmem>>, vector<2x32xf32>
    tpu.vector_store %arg3[%c0_34, %c96], %91 {strides = array<i32>} : memref<3x256xf32, #tpu.memory_space<vmem>>, vector<2x32xf32>,
    %93 = vector.extract_strided_slice %80 {offsets = [0, 4, 0], sizes = [2, 1, 32], strides = [1, 1, 1]} : vector<2x8x32xf32> to vector<2x1x32xf32>
    %94 = vector.shape_cast %93 : vector<2x1x32xf32> to vector<2x32xf32>
    %c0_35 = arith.constant 0 : index
    %c128 = arith.constant 128 : index
    %95 = vector.load %arg3[%c0_35, %c128] : memref<3x256xf32, #tpu.memory_space<vmem>>, vector<2x32xf32>
    tpu.vector_store %arg3[%c0_35, %c128], %94 {strides = array<i32>} : memref<3x256xf32, #tpu.memory_space<vmem>>, vector<2x32xf32>,
    %96 = vector.extract_strided_slice %80 {offsets = [0, 5, 0], sizes = [2, 1, 32], strides = [1, 1, 1]} : vector<2x8x32xf32> to vector<2x1x32xf32>
    %97 = vector.shape_cast %96 : vector<2x1x32xf32> to vector<2x32xf32>
    %c0_36 = arith.constant 0 : index
    %c160 = arith.constant 160 : index
    %98 = vector.load %arg3[%c0_36, %c160] : memref<3x256xf32, #tpu.memory_space<vmem>>, vector<2x32xf32>
    tpu.vector_store %arg3[%c0_36, %c160], %97 {strides = array<i32>} : memref<3x256xf32, #tpu.memory_space<vmem>>, vector<2x32xf32>,
    %99 = vector.extract_strided_slice %80 {offsets = [0, 6, 0], sizes = [2, 1, 32], strides = [1, 1, 1]} : vector<2x8x32xf32> to vector<2x1x32xf32>
    %100 = vector.shape_cast %99 : vector<2x1x32xf32> to vector<2x32xf32>
    %c0_37 = arith.constant 0 : index
    %c192 = arith.constant 192 : index
    %101 = vector.load %arg3[%c0_37, %c192] : memref<3x256xf32, #tpu.memory_space<vmem>>, vector<2x32xf32>
    tpu.vector_store %arg3[%c0_37, %c192], %100 {strides = array<i32>} : memref<3x256xf32, #tpu.memory_space<vmem>>, vector<2x32xf32>,
    %102 = vector.extract_strided_slice %80 {offsets = [0, 7, 0], sizes = [2, 1, 32], strides = [1, 1, 1]} : vector<2x8x32xf32> to vector<2x1x32xf32>
    %103 = vector.shape_cast %102 : vector<2x1x32xf32> to vector<2x32xf32>
    %c0_38 = arith.constant 0 : index
    %c224 = arith.constant 224 : index
    %104 = vector.load %arg3[%c0_38, %c224] : memref<3x256xf32, #tpu.memory_space<vmem>>, vector<2x32xf32>
    tpu.vector_store %arg3[%c0_38, %c224], %103 {strides = array<i32>} : memref<3x256xf32, #tpu.memory_space<vmem>>, vector<2x32xf32>,
    %105 = vector.broadcast %55 : f32 to vector<1x256xf32>
    %c2 = arith.constant 2 : index
    %c0_39 = arith.constant 0 : index
    %106 = vector.load %arg3[%c2, %c0_39] : memref<3x256xf32, #tpu.memory_space<vmem>>, vector<1x256xf32>
    tpu.vector_store %arg3[%c2, %c0_39], %105 {strides = array<i32>} : memref<3x256xf32, #tpu.memory_space<vmem>>, vector<1x256xf32>,
    return
  }
}

</mosaic_0001>

<bundles_post_ra>
// kernel: self_attn_forward.1
= control target key start
LH: loop header
LB: loop body
LE: loop exit
PB: predicated region body
PF: predicated region fallthrough
CT: control target
= control target key end

     0   :  { %vm42_vm0 = vcmask 261120   ;;  %v901_v20 = vmov 0.0   ;;  %vm902_vm1 = vmmov 0   ;;  %vm171_vm2 = vcmask 64512   ;;  %s904_s5 = smov 64   ;;  %s905_s6 = smov 96   ;;  %s1055_s1 = inlined_call_operand.vmem [shape: bf16[2,32,32], index: 1, kind: input, shape index: {}]   ;;  %s1056_s0 = inlined_call_operand.vmem [shape: f32[2,16,32], index: 0, kind: input, shape index: {}]   ;;  %s1057_s2 = inlined_call_operand.vmem [shape: f32[2,32], index: 2, kind: input, shape index: {}]   ;;  %s1058_s3 = inlined_call_operand.vmem [shape: f32[3,256], index: 3, kind: output, shape index: {}]  }
   0x1   :  { %v875_v0 = vld [vmem:[%s1055_s1 + $0x8] sm:$0xff]   ;;  %v876_v1 = vld [vmem:[%s1055_s1] sm:$0xff]   ;;  %v941_v4 = vld [vmem:[%s1056_s0 + $0x10] sm:$0xff]  ;;  %vm258_vm3 = vcmask 130048   ;;  %vm699_vm4 = vcmask 1041409   ;;  %vm701_vm5 = vcmask 1045509  }
   0x2   :  { %820 = vmatprep.subr.bf16.mxu0 %v875_v0  ;;  %v15_v2 = vld [vmem:[%s1056_s0] sm:$0xff]  ;;  %v16_v3 = vld [vmem:[%s1056_s0 + $0x8] sm:$0xff]  ;;  %v946_v6 = vld [vmem:[%s1056_s0 + $0x18] sm:$0xff]  ;;  %vm704_vm6 = vcmask 254976   ;;  %vm712_vm8 = vcmask 517376   ;;  %vm721_vm9 = vcmask 779776  }
   0x3   :  { %821 = vmatpush3.bf16.msra.mxu0 %v875_v0  ;;  %v28_v5 = vpack.c.bf16 %v16_v3, %v15_v2  ;;  %v29_v7 = vpack.c.bf16 %v946_v6, %v941_v4  ;;  %v877_v8 = vld [vmem:[%s1055_s1 + $0x18] sm:$0xff]   ;;  %v878_v9 = vld [vmem:[%s1055_s1 + $0x10] sm:$0xff]   ;;  %vm730_vm10 = vcmask 1042176  }
   0x4   :  { %822 = vmatprep.subr.bf16.mxu0 %v876_v1  ;;  %828 = vmatprep.subr.bf16.mxu1 %v877_v8 }
   0x5   :  { %824 = vmatprep.mubr.msk.bf16.mxu0 %vm42_vm0, %v28_v5  ;;  %829 = vmatpush3.bf16.msra.mxu1 %v877_v8 }
   0x6   :  { %830 = vmatprep.subr.bf16.mxu1 %v878_v9 }
   0x7   :  { %823 = vmatpush3.bf16.msra.mxu0 %v876_v1 }
   0x8   :  { %836 = vmatprep.subr.mxu0 %v901_v20 }
   0x9   :  { %831 = vmatpush3.bf16.msra.mxu1 %v878_v9 }
   0xa   :  { %825 = vmatmul.mubr.msk.bf16.vlgmr.msra.gmra.mxu0 %vm42_vm0, %v29_v7 }
   0xb   :  { %840 = vmatprep.mubr.msk.f32.mxu0 %vm902_vm1, %v901_v20  ;;  %837 = vmatpush3.msra.mxu0 %v16_v3 }
   0xc   :  { %838 = vmatprep.subr.mxu0 %v901_v20 }
   0xd   :  { %839 = vmatpush3.msra.mxu0 %v15_v2 }
   0xe   :  { %850 = vmatprep.subr.mxu0 %v901_v20 }
  0xca   :  { %v826_v10 = vpop.f32.mrf.mxu0 }
  0xcc   :  { %v83_v11 = vpop.f32.mrf.mxu0 }
  0xcd   :  { %879 = vtanh.f32 %v83_v11 }
  0xce   :  { %v827_v12 = vpop.f32.mrf.mxu0 }
  0xcf   :  { %881 = vtanh.f32 %v827_v12 }
  0xd0   :  { %v86_v13 = vpop.f32.mrf.mxu0 }
  0xd1   :  { %883 = vtanh.f32 %v86_v13 }
  0xd2   :  { %885 = vtanh.f32 %v826_v10 }
  0xda   :  { %v880_v14 = vpop.eup %879 }
  0xdc   :  { %v882_v15 = vpop.eup %881 }
  0xde   :  { %v884_v16 = vpop.eup %883 }
  0xdf   :  { %v886_v17 = vpop.eup %885  ;;  %v102_v18 = vpack.c.bf16 %v884_v16, %v880_v14 }
  0xe0   :  { %v103_v19 = vpack.c.bf16 %v882_v15, %v886_v17 }
  0xe1   :  { %832 = vmatprep.mubr.msk.bf16.mxu1 %vm42_vm0, %v102_v18 }
  0xe2   :  { %833 = vmatmul.mubr.msk.bf16.vlgmr.msra.gmra.mxu1 %vm42_vm0, %v103_v19 }
 0x1a2   :  { %v834_v21 = vpop.f32.mrf.mxu1 }
 0x1a3   :  { %v181_v24 = vsel %vm171_vm2, %v834_v21, -inf }
 0x1a4   :  { %v156_v22 = vpop.f32.mrf.mxu1 }
 0x1a5   :  { %v172_v28 = vsel %vm171_vm2, %v156_v22, -inf }
 0x1a6   :  { %v835_v23 = vpop.f32.mrf.mxu1 }
 0x1a7   :  { %v182_v25 = vsel %vm171_vm2, %v835_v23, -inf }
 0x1a8   :  { %v183_v26 = vmax.f32 %v181_v24, %v182_v25  ;;  %v159_v27 = vpop.f32.mrf.mxu1 }
 0x1a9   :  { %v173_v29 = vsel %vm171_vm2, %v159_v27, -inf }
 0x1aa   :  { %v184_v30 = vrot.slane %v183_v26, 4  ;;  %v174_v31 = vmax.f32 %v172_v28, %v173_v29 }
 0x1ac   :  { %v185_v32 = vmax.f32 %v183_v26, %v184_v30  ;;  %v175_v33 = vrot.slane %v174_v31, 4 }
 0x1ae   :  { %v186_v34 = vrot.slane %v185_v32, 2  ;;  %v176_v35 = vmax.f32 %v174_v31, %v175_v33 }
 0x1b0   :  { %v187_v36 = vmax.f32 %v185_v32, %v186_v34  ;;  %v177_v37 = vrot.slane %v176_v35, 2 }
 0x1b2   :  { %v188_v38 = vrot.slane %v187_v36, 1  ;;  %v178_v39 = vmax.f32 %v176_v35, %v177_v37 }
 0x1b4   :  { %v189_v40 = vmax.f32 %v187_v36, %v188_v38  ;;  %v179_v41 = vrot.slane %v178_v39, 1 }
 0x1b6   :  { %v192_v42 = vsub.f32 %v834_v21, %v189_v40  ;;  %v193_v43 = vsub.f32 %v835_v23, %v189_v40  ;;  %v180_v44 = vmax.f32 %v178_v39, %v179_v41 }
 0x1b8   :  { %v198_v45 = vmul.f32 1.442695, %v192_v42  ;;  %v200_v46 = vmul.f32 1.442695, %v193_v43  ;;  %v190_v47 = vsub.f32 %v156_v22, %v180_v44  ;;  %v191_v48 = vsub.f32 %v159_v27, %v180_v44 }
 0x1ba   :  { %887 = vpow2.f32 %v198_v45  ;;  %v194_v49 = vmul.f32 1.442695, %v190_v47  ;;  %v196_v50 = vmul.f32 1.442695, %v191_v48 }
 0x1bb   :  { %889 = vpow2.f32 %v200_v46 }
 0x1bc   :  { %891 = vpow2.f32 %v194_v49 }
 0x1bd   :  { %893 = vpow2.f32 %v196_v50 }
 0x1c7   :  { %v888_v51 = vpop.eup %887 }
 0x1c8   :  { %v890_v52 = vpop.eup %889  ;;  %v211_v53 = vsel %vm171_vm2, %v888_v51, 0.0 }
 0x1c9   :  { %v892_v54 = vpop.eup %891  ;;  %v212_v55 = vsel %vm171_vm2, %v890_v52, 0.0 }
 0x1ca   :  { %v894_v56 = vpop.eup %893  ;;  %v213_v57 = vadd.f32 %v212_v55, %v211_v53  ;;  %v202_v58 = vsel %vm171_vm2, %v892_v54, 0.0 }
 0x1cb   :  { %v203_v59 = vsel %vm171_vm2, %v894_v56, 0.0 }
 0x1cc   :  { %v214_v60 = vrot.slane %v213_v57, 4  ;;  %v204_v61 = vadd.f32 %v203_v59, %v202_v58 }
 0x1ce   :  { %v215_v62 = vadd.f32 %v214_v60, %v213_v57  ;;  %v205_v63 = vrot.slane %v204_v61, 4 }
 0x1d0   :  { %v216_v0 = vrot.slane %v215_v62, 2  ;;  %v206_v1 = vadd.f32 %v205_v63, %v204_v61 }
 0x1d2   :  { %v217_v2 = vadd.f32 %v216_v0, %v215_v62  ;;  %v207_v3 = vrot.slane %v206_v1, 2 }
 0x1d4   :  { %v218_v5 = vrot.slane %v217_v2, 1  ;;  %v208_v7 = vadd.f32 %v207_v3, %v206_v1 }
 0x1d6   :  { %v219_v8 = vadd.f32 %v218_v5, %v217_v2  ;;  %v209_v9 = vrot.slane %v208_v7, 1 }
 0x1d8   :  { %895 = vrcp.f32 %v219_v8  ;;  %v210_v10 = vadd.f32 %v209_v9, %v208_v7 }
 0x1da   :  { %897 = vrcp.f32 %v210_v10 }
 0x1e5   :  { %v896_v11 = vpop.eup %895 }
 0x1e6   :  { %v224_v12 = vmul.f32 %v896_v11, %v888_v51  ;;  %v225_v16 = vmul.f32 %v896_v11, %v890_v52 }
 0x1e7   :  { %v898_v13 = vpop.eup %897 }
 0x1e8   :  { %428 = vxpose.xlu1.b32.start [1/2] (short) (narrow) %v224_v12, 8  ;;  %v222_v14 = vmul.f32 %v898_v13, %v894_v56  ;;  %v221_v15 = vmul.f32 %v898_v13, %v892_v54  ;;  %v631_v19 = vmul.f32 %v224_v12, %v224_v12  ;;  %v632_v21 = vmul.f32 %v225_v16, %v225_v16 }
 0x1ea   :  { %843 = vmatprep.subr.msk.mxu1 %vm171_vm2, %v222_v14  ;;  %226 = vxpose.xlu0.b32.start [1/2] (short) (narrow) %v221_v15, 8  ;;  %v629_v17 = vmul.f32 %v221_v15, %v221_v15  ;;  %v630_v18 = vmul.f32 %v222_v14, %v222_v14  ;;  %v636_v25 = vsel %vm171_vm2, %v631_v19, 0.0  ;;  %v638_v27 = vsel %vm171_vm2, %v632_v21, 0.0 }
 0x1eb   :  { %847 = vmatprep.mubr.msk.f32.mxu1 %vm171_vm2, %v221_v15  ;;  %844 = vmatpush3.xpose.msk.msra.mxu1 %vm171_vm2, %v222_v14 }
 0x1ec   :  { %429 = vxpose.xlu1.b32.end [2/2] (short) (narrow) %v225_v16, 8  ;;  %845 = vmatprep.subr.msk.mxu1 %vm171_vm2, %v221_v15  ;;  %v633_v22 = vsel %vm171_vm2, %v629_v17, 0.0  ;;  %v634_v23 = vsel %vm171_vm2, %v630_v18, 0.0 }
 0x1ed   :  { %v635_v24 = vadd.f32 %v634_v23, %v633_v22 }
 0x1ee   :  { %227 = vxpose.xlu0.b32.end [2/2] (short) (narrow) %v222_v14, 8 }
 0x1ef   :  { %846 = vmatpush3.xpose.msk.msra.mxu1 %vm171_vm2, %v221_v15  ;;  %v637_v26 = vadd.f32 %v636_v25, %v635_v24 }
 0x1f0   :  { %857 = vmatprep.subr.msk.mxu1 %vm171_vm2, %v225_v16 }
 0x1f1   :  { %v639_v28 = vadd.f32 %v638_v27, %v637_v26 }
 0x1f2   :  { %848 = vmatmul.mubr.msk.f32.vlgmr.msra.gmra.mxu1 %vm171_vm2, %v222_v14 }
 0x1f3   :  { %858 = vmatpush3.xpose.msk.msra.mxu1 %vm171_vm2, %v225_v16  ;;  %861 = vmatprep.mubr.msk.f32.mxu1 %vm171_vm2, %v224_v12 }
 0x1f4   :  { %859 = vmatprep.subr.msk.mxu1 %vm171_vm2, %v224_v12 }
 0x1f7   :  { %860 = vmatpush3.xpose.msk.msra.mxu1 %vm171_vm2, %v224_v12 }
 0x1fa   :  { %862 = vmatmul.mubr.msk.f32.vlgmr.msra.gmra.mxu1 %vm171_vm2, %v225_v16 }
 0x264   :  { %v444_v30 = vpop.trf.xlu1 }
 0x266   :  { %v242_v29 = vpop.trf.xlu0 }
 0x267   :  { %841 = vmatmul.mubr.msk.f32.vlgmr.msra.gmra.mxu0 %vm258_vm3, %v242_v29 }
 0x268   :  { %851 = vmatpush3.msra.mxu0 %v946_v6  ;;  %854 = vmatprep.mubr.msk.f32.mxu0 %vm902_vm1, %v901_v20 }
 0x269   :  { %852 = vmatprep.subr.mxu0 %v901_v20 }
 0x26a   :  { %853 = vmatpush3.msra.mxu0 %v941_v4 }
 0x26b   :  { %855 = vmatmul.mubr.msk.f32.vlgmr.msra.gmra.mxu0 %vm258_vm3, %v444_v30 }
 0x2b2   :  { %v849_v31 = vpop.f32.mrf.mxu1 }
 0x2b3   :  { %v414_v32 = vmul.f32 %v849_v31, %v849_v31 }
 0x2b4   :  { %v404_v33 = vpop.f32.mrf.mxu1 }
 0x2b5   :  { %v413_v34 = vmul.f32 %v404_v33, %v404_v33  ;;  %v416_v36 = vsel %vm258_vm3, %v414_v32, 0.0  ;;  %v795_v32 = vld [vmem:[%s1057_s2] ss:$0 sm:$0xff] }
 0x2b7   :  { %v415_v35 = vsel %vm258_vm3, %v413_v34, 0.0 }
 0x2b8   :  { %v417_v37 = vadd.f32 %v416_v36, %v415_v35  ;;  %v796_v35 = vld [vmem:[%s1057_s2 + $0x1] ss:$0 sm:$0xff]  ;;  %s903_s2 = smov 32  }
 0x2ba   :  { %v863_v6 = vpop.f32.mrf.mxu1  ;;  %418 = vadd.xlane.f32.xlu0 %v417_v37 }
 0x2bb   :  { %v615_v38 = vmul.f32 %v863_v6, %v863_v6 }
 0x2bc   :  { %v605_v39 = vpop.f32.mrf.mxu1 }
 0x2bd   :  { %v614_v40 = vmul.f32 %v605_v39, %v605_v39  ;;  %v617_v4 = vsel %vm258_vm3, %v615_v38, 0.0 }
 0x2bf   :  { %v616_v20 = vsel %vm258_vm3, %v614_v40, 0.0 }
 0x2c0   :  { %v618_v41 = vadd.f32 %v617_v4, %v616_v20 }
 0x2c2   :  { %619 = vadd.xlane.f32.xlu1 %v618_v41 }
 0x2c6   :  { %640 = vadd.xlane.f32.xlu1 %v639_v28 }
 0x327   :  { %v328_v42 = vpop.f32.mrf.mxu0 }
 0x328   :  { %v653_v45 = vsel %vm42_vm0, %v328_v42, 0.0 }
 0x329   :  { %v842_v43 = vpop.f32.mrf.mxu0 }
 0x32b   :  { %v529_v44 = vpop.f32.mrf.mxu0 }
 0x32c   :  { %v654_v46 = vsel %vm42_vm0, %v529_v44, 0.0 }
 0x32d   :  { %v655_v47 = vadd.f32 %v654_v46, %v653_v45  ;;  %v856_v48 = vpop.f32.mrf.mxu0 }
 0x32f   :  { %v656_v49 = vrot.slane %v655_v47, 4 }
 0x331   :  { %v657_v50 = vadd.f32 %v656_v49, %v655_v47 }
 0x333   :  { %v658_v51 = vrot.slane %v657_v50, 2 }
 0x335   :  { %v659_v52 = vadd.f32 %v658_v51, %v657_v50 }
 0x337   :  { %v660_v53 = vrot.slane %v659_v52, 1 }
 0x339   :  { %v661_v54 = vadd.f32 %v660_v53, %v659_v52 }
 0x33b   :  { %v663_v55 = vmul.f32 0.0625, %v661_v54 }
 0x33d   :  { %v664_v56 = vsub.f32 %v328_v42, %v663_v55  ;;  %v665_v57 = vsub.f32 %v529_v44, %v663_v55 }
 0x33f   :  { %v666_v58 = vmul.f32 %v664_v56, %v664_v56  ;;  %v667_v59 = vmul.f32 %v665_v57, %v665_v57 }
 0x341   :  { %v668_v60 = vsel %vm42_vm0, %v666_v58, 0.0  ;;  %v669_v61 = vsel %vm42_vm0, %v667_v59, 0.0 }
 0x342   :  { %v670_v62 = vadd.f32 %v669_v61, %v668_v60 }
 0x343   :  { %v419_v63 = vpop.xlane.xlu0 %418 }
 0x344   :  { %v671_v0 = vrot.slane %v670_v62, 4  ;;  %v420_v1 = vrot.slane %v419_v63, 4 }
 0x346   :  { %v672_v2 = vadd.f32 %v671_v0, %v670_v62  ;;  %v421_v3 = vadd.f32 %v420_v1, %v419_v63 }
 0x348   :  { %v673_v5 = vrot.slane %v672_v2, 2  ;;  %v422_v7 = vrot.slane %v421_v3, 2 }
 0x34a   :  { %v674_v8 = vadd.f32 %v673_v5, %v672_v2  ;;  %v423_v9 = vadd.f32 %v422_v7, %v421_v3  ;;  %v763_v3 = vlaneseq }
 0x34b   :  { %v620_v10 = vpop.xlane.xlu1 %619 }
 0x34c   :  { %v675_v11 = vrot.slane %v674_v8, 1  ;;  %v621_v12 = vrot.slane %v620_v10, 4  ;;  %v424_v13 = vrot.slane %v423_v9, 1  ;;  %vm765_vm7 = vcmp.lt.s32.totalorder %v763_v3, 256 }
 0x34e   :  { %v676_v14 = vadd.f32 %v675_v11, %v674_v8  ;;  %v622_v15 = vadd.f32 %v621_v12, %v620_v10  ;;  %v425_v16 = vadd.f32 %v424_v13, %v423_v9 }
 0x34f   :  { %v641_v17 = vpop.xlane.xlu1 %640 }
 0x350   :  { %v677_v18 = vmul.f32 0.0625, %v676_v14  ;;  %v623_v19 = vrot.slane %v622_v15, 2  ;;  %v642_v21 = vrot.slane %v641_v17, 4  ;;  %864 = vpush %v425_v16 }
 0x352   :  { %v678_v22 = vadd.f32 1e-05, %v677_v18  ;;  %v643_v23 = vadd.f32 %v642_v21, %v641_v17  ;;  %v624_v24 = vadd.f32 %v623_v19, %v622_v15 }
 0x354   :  { %899 = vrsqrt.f32 %v678_v22  ;;  %v644_v25 = vrot.slane %v643_v23, 2  ;;  %v625_v26 = vrot.slane %v624_v24, 1 }
 0x356   :  { %v626_v27 = vadd.f32 %v625_v26, %v624_v24  ;;  %v645_v28 = vadd.f32 %v644_v25, %v643_v23 }
 0x358   :  { %866 = vpush %v626_v27  ;;  %v646_v29 = vrot.slane %v645_v28, 1 }
 0x35a   :  { %v647_v30 = vadd.f32 %v646_v29, %v645_v28 }
 0x35c   :  { %868 = vpush %v647_v30 }
 0x361   :  { %v900_v31 = vpop.eup %899 }
 0x362   :  { %v680_v33 = vmul.f32 %v900_v31, %v664_v56  ;;  %v681_v34 = vmul.f32 %v900_v31, %v665_v57 }
 0x364   :  { %v687_v36 = vmul.f32 %v795_v32, %v680_v33  ;;  %v688_v37 = vmul.f32 %v795_v32, %v681_v34 }
 0x366   :  { %v694_v6 = vadd.f32 %v796_v35, %v687_v36  ;;  %v695_v38 = vadd.f32 %v796_v35, %v688_v37 }
 0x368   :  { %v706_v39 = vrot.slane %v694_v6, 1  ;;  %v732_v40 = vcombine.high %v694_v6, %v694_v6  ;;  %v733_v20 = vcombine.high %v695_v38, %v695_v38  ;;  %v714_v4 = vrot.slane %v694_v6, 2 }
 0x369   :  { %v715_v41 = vrot.slane %v695_v38, 1  ;;  %v698_v42 = vrot.slane %v695_v38, 7  ;;  %v723_v45 = vrot.slane %v694_v6, 3  ;;  %v724_v46 = vrot.slane %v695_v38, 2 }
 0x36a   :  { %v707_v43 = vsel %vm699_vm4, %v695_v38, %v706_v39  ;;  %v739_v44 = vrot.slane %v732_v40, 1  ;;  %v746_v50 = vrot.slane %v732_v40, 2  ;;  %v747_v51 = vrot.slane %v733_v20, 1 }
 0x36b   :  { %v708_v47 = vsel %vm701_vm5, %v695_v38, %v707_v43  ;;  %v716_v49 = vsel %vm699_vm4, %v715_v41, %v714_v4  ;;  %v700_v53 = vsel %vm699_vm4, %v698_v42, %v694_v6  ;;  %v725_v54 = vsel %vm699_vm4, %v724_v46, %v723_v45 }
 0x36c   :  { %709 = vrot.lane.b32.xlu1 %v708_v47, %s903_s2  ;;  %v740_v48 = vsel %vm699_vm4, %v733_v20, %v739_v44  ;;  %v702_v55 = vsel %vm701_vm5, %v698_v42, %v700_v53  ;;  %v734_v56 = vrot.slane %v733_v20, 7  ;;  %v717_v57 = vsel %vm701_vm5, %v715_v41, %v716_v49 }
 0x36d   :  { %v741_v52 = vsel %vm701_vm5, %v733_v20, %v740_v48  ;;  %705 = vst.msk [vmem:[%s1058_s3] sm:$0x3] %vm704_vm6, %v702_v55  ;;  %v748_v58 = vsel %vm699_vm4, %v747_v51, %v746_v50  ;;  %v754_v59 = vrot.slane %v732_v40, 3  ;;  %v755_v60 = vrot.slane %v733_v20, 2 }
 0x36e   :  { %742 = vrot.lane.b32.xlu0 %v741_v52, %s903_s2  ;;  %v735_v61 = vsel %vm699_vm4, %v734_v56, %v732_v40  ;;  %v726_v62 = vsel %vm701_vm5, %v724_v46, %v725_v54  ;;  %v749_v0 = vsel %vm701_vm5, %v747_v51, %v748_v58 }
 0x36f   :  { %v736_v63 = vsel %vm701_vm5, %v734_v56, %v735_v61  ;;  %v756_v1 = vsel %vm699_vm4, %v755_v60, %v754_v59 }
 0x370   :  { %718 = vrot.lane.b32.xlu1 %v717_v57, %s904_s5  ;;  %738 = vst.msk [vmem:[%s1058_s3 + $0x4] sm:$0x3] %vm704_vm6, %v736_v63  ;;  %v757_v2 = vsel %vm701_vm5, %v755_v60, %v756_v1 }
 0x372   :  { %727 = vrot.lane.b32.xlu0 %v726_v62, %s905_s6 }
 0x374   :  { %750 = vrot.lane.b32.xlu1 %v749_v0, %s904_s5 }
 0x378   :  { %758 = vrot.lane.b32.xlu1 %v757_v2, %s905_s6 }
 0x381   :  { %s865_s9 = spop %864 }
 0x389   :  { %s867_s10 = spop %866 }
 0x38a   :  { %s628_s12 = sadd.f32 %s867_s10, %s865_s9 }
 0x38d   :  { %s869_s11 = spop %868 }
 0x38e   :  { %s649_s13 = smul.f32 2.0, %s869_s11 }
 0x390   :  { %s650_s14 = ssub.f32 %s628_s12, %s649_s13 }
 0x392   :  { %s651_s15 = sadd.f32 16.0, %s650_s14 }
 0x394   :  { %s652_s16 = smul.f32 0.5, %s651_s15 }
 0x396   :  { %v762_v5 = vstv %s652_s16 }
 0x397   :  { %797 = vst.msk [vmem:[%s1058_s3 + $0x2] ss:$4 sm:$0x3] %vm765_vm7, %v762_v5 }
 0x3de   :  { %v710_v7 = vpop.permute.xlu1 %709 }
 0x3df   :  { %713 = vst.msk [vmem:[%s1058_s3] sm:$0x3] %vm712_vm8, %v710_v7 }
 0x3e0   :  { %v743_v8 = vpop.permute.xlu0 %742 }
 0x3e1   :  { %745 = vst.msk [vmem:[%s1058_s3 + $0x4] sm:$0x3] %vm712_vm8, %v743_v8 }
 0x3e2   :  { %v719_v9 = vpop.permute.xlu1 %718 }
 0x3e3   :  { %722 = vst.msk [vmem:[%s1058_s3] sm:$0x3] %vm721_vm9, %v719_v9 }
 0x3e4   :  { %v728_v10 = vpop.permute.xlu0 %727 }
 0x3e5   :  { %731 = vst.msk [vmem:[%s1058_s3] sm:$0x3] %vm730_vm10, %v728_v10 }
 0x3e6   :  { %v751_v11 = vpop.permute.xlu1 %750 }
 0x3e7   :  { %753 = vst.msk [vmem:[%s1058_s3 + $0x4] sm:$0x3] %vm721_vm9, %v751_v11 }
 0x3ea   :  { %v759_v12 = vpop.permute.xlu1 %758 }
 0x3eb   :  { %761 = vst.msk [vmem:[%s1058_s3 + $0x4] sm:$0x3] %vm730_vm10, %v759_v12 }

</bundles_post_ra>
